<compile_context>
chip_gen: v7x
topology: tpu7x:2x2x1
jax: 0.10.0
libtpu: 0.0.40
codegen_flags: <defaults>
</compile_context>

<pallas_src>
import math

import jax
import jax.numpy as jnp
from jax import lax
from jax.experimental import pallas as pl
from jax.experimental.pallas import tpu as pltpu


# --------------------------------------------------------------------------
# Dispatch thresholds
# --------------------------------------------------------------------------
_SMALL_ITEM_BYTES = 1 << 20    # below this, XLA dynamic-slice/switch wins (launch cost dominates)
_CHUNK_TARGET_BYTES = 8 << 20  # aim for ~8 MiB per DMA chunk for very large items
_MAX_CHUNKS = 8


def _normalize_index(idx, num_items):
    """int32, negative-index fixup, clamp to [0, num_items-1], shape (1,)."""
    idx = jnp.asarray(idx, dtype=jnp.int32)
    idx = jnp.where(idx < 0, idx + num_items, idx)
    idx = jnp.clip(idx, 0, num_items - 1)
    return idx.reshape((1,))


def _pick_n_chunks(item_shape, item_bytes, requested):
    """Number of row-chunks for the stacked-select DMA (must divide rows)."""
    if len(item_shape) == 0:
        return 1
    rows = item_shape[0]
    if requested is not None:
        n = int(requested)
    else:
        n = max(1, min(_MAX_CHUNKS, item_bytes // _CHUNK_TARGET_BYTES))
    n = max(1, min(n, rows))
    while rows % n != 0:  # keep every chunk the same static shape
        n -= 1
    return n


# --------------------------------------------------------------------------
# Kernels (dynamic-index path only; static index needs no kernel at all).
# --------------------------------------------------------------------------
def _make_stacked_select_kernel(n_chunks, rows_per_chunk):
    """x_hbm: (num_items, *item_shape) HBM ref; o_hbm: (*item_shape) HBM ref.

    Direct HBM->HBM DMA of the selected item only.  For n_chunks > 1 the item
    is split along its leading axis and all chunk DMAs are started before any
    is waited on (multiple copies in flight)."""

    def kernel(idx_ref, x_hbm, o_hbm, copy_sems):
        idx = idx_ref[0]
        if n_chunks == 1:
            cp = pltpu.make_async_copy(x_hbm.at[idx], o_hbm, copy_sems.at[0])
            cp.start()
            cp.wait()
            return
        copies = []
        for c in range(n_chunks):
            r0 = c * rows_per_chunk
            copies.append(
                pltpu.make_async_copy(
                    x_hbm.at[idx, pl.ds(r0, rows_per_chunk)],
                    o_hbm.at[pl.ds(r0, rows_per_chunk)],
                    copy_sems.at[c],
                )
            )
        for cp in copies:   # start all ...
            cp.start()
        for cp in copies:   # ... then wait all
            cp.wait()

    return kernel


def _make_tuple_select_kernel(num_items):
    """One raw HBM ref per candidate; only the selected one is DMA'd.

    The index is pre-clamped in the wrapper, so exactly one branch fires and
    the output is always written."""

    def kernel(idx_ref, *refs):
        item_refs = refs[:num_items]
        o_hbm = refs[num_items]
        copy_sem = refs[num_items + 1]
        idx = idx_ref[0]
        for i in range(num_items):
            @pl.when(idx == i)
            def _(i=i):
                cp = pltpu.make_async_copy(item_refs[i], o_hbm, copy_sem)
                cp.start()
                cp.wait()

    return kernel


# --------------------------------------------------------------------------
# Pallas wrappers (dynamic index, large items / forced)
# --------------------------------------------------------------------------
def _pallas_select_from_stacked(stacked, idx, *, n_chunks=None):
    num_items = stacked.shape[0]
    item_shape = stacked.shape[1:]
    item_bytes = math.prod(item_shape) * jnp.dtype(stacked.dtype).itemsize
    n = _pick_n_chunks(item_shape, item_bytes, n_chunks)
    rows_per_chunk = item_shape[0] // n if n > 1 else 0
    idx = _normalize_index(idx, num_items)

    grid_spec = pltpu.PrefetchScalarGridSpec(
        num_scalar_prefetch=1,
        grid=(1,),
        in_specs=[pl.BlockSpec(memory_space=pl.ANY)],
        out_specs=pl.BlockSpec(memory_space=pl.ANY),
        scratch_shapes=[pltpu.SemaphoreType.DMA((n,))],
    )
    return pl.pallas_call(
        _make_stacked_select_kernel(n, rows_per_chunk),
        out_shape=jax.ShapeDtypeStruct(item_shape, stacked.dtype),
        grid_spec=grid_spec,
        compiler_params=pltpu.CompilerParams(dimension_semantics=("arbitrary",)),
    )(idx, stacked)


def _pallas_select_from_items(items, idx):
    num_items = len(items)
    shape, dtype = items[0].shape, items[0].dtype
    for it in items:
        if it.shape != shape or it.dtype != dtype:
            raise ValueError(
                "Dynamic SelectItem over a tuple requires same-shaped/dtyped "
                "items; use a static Python item_index for heterogeneous tuples."
            )
    idx = _normalize_index(idx, num_items)

    grid_spec = pltpu.PrefetchScalarGridSpec(
        num_scalar_prefetch=1,
        grid=(1,),
        in_specs=[pl.BlockSpec(memory_space=pl.ANY)] * num_items,
        out_specs=pl.BlockSpec(memory_space=pl.ANY),
        scratch_shapes=[pltpu.SemaphoreType.DMA(())],
    )
    return pl.pallas_call(
        _make_tuple_select_kernel(num_items),
        out_shape=jax.ShapeDtypeStruct(shape, dtype),
        grid_spec=grid_spec,
        compiler_params=pltpu.CompilerParams(dimension_semantics=("arbitrary",)),
    )(idx, *items)


# --------------------------------------------------------------------------
# Public wrapper
# --------------------------------------------------------------------------
def select_item(inputs, item_index, *, use_pallas=None, n_chunks=None):
    """Pallas-backed equivalent of SelectItem(item_index)(inputs).

    use_pallas=None  -> size-based dispatch (XLA fallback for small items)
    use_pallas=True  -> force the Pallas HBM->HBM DMA path (dynamic index)
    use_pallas=False -> force the XLA fallback (dynamic index)
    """
    static_index = isinstance(item_index, int) and not isinstance(item_index, bool)

    if isinstance(inputs, (tuple, list)):
        if static_index:
            # Canonical nn.Module case (e.g. GRU's (output, h_n)):
            # zero HBM traffic, no kernel, supports heterogeneous shapes.
            return inputs[item_index]
        items = tuple(inputs)
        item_bytes = math.prod(items[0].shape) * jnp.dtype(items[0].dtype).itemsize
        if use_pallas is None:
            use_pallas = item_bytes >= _SMALL_ITEM_BYTES
        if not use_pallas:
            idx = _normalize_index(item_index, len(items))[0]
            return lax.switch(idx, [lambda it=it: it for it in items])
        return _pallas_select_from_items(items, item_index)

    # Already-stacked array with a leading item axis.
    if static_index:
        return inputs[item_index]  # plain slice; XLA fuses it into consumers
    num_items = inputs.shape[0]
    item_bytes = math.prod(inputs.shape[1:]) * jnp.dtype(inputs.dtype).itemsize
    if use_pallas is None:
        use_pallas = item_bytes >= _SMALL_ITEM_BYTES
    if not use_pallas:
        idx = _normalize_index(item_index, num_items)[0]
        return lax.dynamic_index_in_dim(inputs, idx, axis=0, keepdims=False)
    return _pallas_select_from_stacked(inputs, item_index, n_chunks=n_chunks)


class SelectItem:
    """Mirror of the PyTorch module: SelectItem(i)(inputs) == inputs[i]."""

    def __init__(self, item_index):
        self._name = "selectitem"
        self.item_index = item_index

    def __call__(self, inputs):
        return select_item(inputs, self.item_index)


# --------------------------------------------------------------------------
# Demo / self-check
# --------------------------------------------------------------------------
if __name__ == "__main__":
    key = jax.random.PRNGKey(0)
    k0, k1, k2 = jax.random.split(key, 3)

    B, T, H, L = 2, 8, 32, 1  # batch, seq, hidden, gru layers

    gru_out = jax.random.normal(k0, (B, T, H), dtype=jnp.float32)
    gru_hid = jax.random.normal(k1, (L, B, H), dtype=jnp.float32)

    # Case 1: canonical SelectItem(0) on GRU-style (output, h_n) with different
    # shapes; static index -> direct Python pick, no kernel, no copy.
    y0 = SelectItem(0)((gru_out, gru_hid))
    assert y0 is gru_out

    # Case 2: dynamic (traced) index over a tuple of same-shaped candidates;
    # force the Pallas path (only the selected item is DMA'd HBM->HBM).
    item0 = gru_out
    item1 = jax.random.normal(k2, (B, T, H), dtype=jnp.float32)
    y1 = select_item((item0, item1), jnp.asarray(1, jnp.int32), use_pallas=True)
    y1 = jax.block_until_ready(y1)
    assert y1.shape == item1.shape and y1.dtype == item1.dtype
    assert bool(jnp.array_equal(y1, item1))

    # Case 3: dynamic index into an already-stacked array, exercising the
    # chunked (start-all-then-wait-all) DMA path.
    stacked = jnp.stack([item0, item1], axis=0)  # input construction for demo only
    y2 = select_item(stacked, jnp.asarray(0, jnp.int32), use_pallas=True, n_chunks=2)
    y2 = jax.block_until_ready(y2)
    assert bool(jnp.array_equal(y2, item0))

    # Case 4: out-of-range index is clamped -> no OOB DMA, no stale output.
    y3 = select_item(stacked, jnp.asarray(5, jnp.int32), use_pallas=True)
    y3 = jax.block_until_ready(y3)
    assert bool(jnp.array_equal(y3, item1))

    # Case 5: default dispatch for a small item -> XLA dynamic-slice fallback
    # (no pallas_call launch cost, fuses into consumers).
    y4 = select_item(stacked, jnp.asarray(1, jnp.int32))
    y4 = jax.block_until_ready(y4)
    assert bool(jnp.array_equal(y4, item1))

    print("KERNEL_OK")
</pallas_src>

<mosaic_0001>
module attributes {stable_mosaic.version = 11 : i64} {
  func.func @kernel(%arg0: i32, %arg1: memref<1xi32, #tpu.memory_space<smem>>, %arg2: memref<2x8x32xf32, #tpu.memory_space<any>>, %arg3: memref<2x8x32xf32, #tpu.memory_space<any>>, %arg4: memref<2x8x32xf32, #tpu.memory_space<any>>, %arg5: memref<!tpu.dma_semaphore, #tpu.memory_space<semaphore_mem>>) attributes {dimension_semantics = [#tpu.dimension_semantics<arbitrary>], iteration_bounds = array<i64: 1>, scalar_prefetch = 1 : i64, scratch_operands = 1 : i64, tpu.core_type = #tpu.core_type<tc>, window_params = [{}, {}, {}]} {
    %c0 = arith.constant 0 : index
    %0 = memref.load %arg1[%c0] : memref<1xi32, #tpu.memory_space<smem>>
    %c0_i32 = arith.constant 0 : i32
    %1 = arith.cmpi eq, %0, %c0_i32 : i32
    %2 = arith.extui %1 : i1 to i32
    %c0_i32_0 = arith.constant 0 : i32
    %3 = arith.cmpi ne, %2, %c0_i32_0 : i32
    scf.if %3 {
      tpu.enqueue_dma source(%arg2 : memref<2x8x32xf32, #tpu.memory_space<any>>) target(%arg4 : memref<2x8x32xf32, #tpu.memory_space<any>>) target_semaphore(%arg5 : memref<!tpu.dma_semaphore, #tpu.memory_space<semaphore_mem>>)
      tpu.wait_dma2 semaphore(%arg5 : memref<!tpu.dma_semaphore, #tpu.memory_space<semaphore_mem>>) src(%arg2 : memref<2x8x32xf32, #tpu.memory_space<any>>) dst(%arg4 : memref<2x8x32xf32, #tpu.memory_space<any>>)
    } else {
    }
    %c1_i32 = arith.constant 1 : i32
    %4 = arith.cmpi eq, %0, %c1_i32 : i32
    %5 = arith.extui %4 : i1 to i32
    %c0_i32_1 = arith.constant 0 : i32
    %6 = arith.cmpi ne, %5, %c0_i32_1 : i32
    scf.if %6 {
      tpu.enqueue_dma source(%arg3 : memref<2x8x32xf32, #tpu.memory_space<any>>) target(%arg4 : memref<2x8x32xf32, #tpu.memory_space<any>>) target_semaphore(%arg5 : memref<!tpu.dma_semaphore, #tpu.memory_space<semaphore_mem>>)
      tpu.wait_dma2 semaphore(%arg5 : memref<!tpu.dma_semaphore, #tpu.memory_space<semaphore_mem>>) src(%arg3 : memref<2x8x32xf32, #tpu.memory_space<any>>) dst(%arg4 : memref<2x8x32xf32, #tpu.memory_space<any>>)
    } else {
    }
    return
  }
}

</mosaic_0001>

<bundles_post_ra>
// kernel: tpu_custom_call.1
= control target key start
LH: loop header
LB: loop body
LE: loop exit
PB: predicated region body
PF: predicated region fallthrough
CT: control target
= control target key end

     0   :  { %s81_s14 = smov [#allocation2]   ;;  %s82_s15 = smov [#allocation5]   ;;  %s123_s0 = inlined_call_operand.<no memory space> [shape: s32[1], index: 0, kind: input, shape index: {}]   ;;  %s124_s1 = inlined_call_operand.hbm [shape: f32[2,8,32], index: 1, kind: input, shape index: {}]   ;;  %s125_s2 = inlined_call_operand.hbm [shape: f32[2,8,32], index: 2, kind: input, shape index: {}]   ;;  %s126_s3 = inlined_call_operand.hbm [shape: f32[2,8,32], index: 3, kind: output, shape index: {}]  }
   0x1   :  { %p67_p0 = scmp.eq.s32.totalorder %s123_s0, 0  ;;  %s83_s16 = smov 0  }
   0x3   :  { %62 = dma.general (%p67_p0), %s124_s1, 256, %s126_s3, %s81_s14, %s82_s15, [#allocation6], %s83_s16, 0  }
   0x4   :  { %74 = dma.done.wait (%p67_p0), [#allocation2], 256 }
   0x5   :  { %76 = vsyncadd (%p67_p0), [#allocation2], 4294967040  ;;  %p68_p1 = scmp.eq.s32.totalorder %s123_s0, 1  ;;  %s84_s23 = smov [#allocation7]  }
   0x7   :  { %65 = dma.general (%p68_p1), %s125_s2, 256, %s126_s3, %s81_s14, %s84_s23, [#allocation8], %s83_s16, 0  }
   0x8   :  { %78 = dma.done.wait (%p68_p1), [#allocation2], 256 }
   0x9   :  { %80 = vsyncadd (%p68_p1), [#allocation2], 4294967040 }
   0xa   :  { %52 = vsyncmov [#allocation2] }
   0xd   :  { %s53_s28 = vpop.sfrf %52 }
   0xe   :  { %p60_p2 = scmp.ne.s32.totalorder %s53_s28, 0 }
  0x10   :  { %57 = shalt.err (%p60_p2)  }

</bundles_post_ra>
